<compile_context>
chip_gen: v6e
topology: v6e:2x2x1
jax: 0.10.0
libtpu: 0.0.40
codegen_flags: <defaults>
</compile_context>

<pallas_src>
import math

import jax
import jax.numpy as jnp
from jax.experimental import pallas as pl
from jax.experimental.pallas import tpu as pltpu

# ---- problem sizes -----------------------------------------------------------
IN_DIM = 3                        # 3-D points
N_FREQ = 4                        # frequency encoding levels
ENC_DIM = IN_DIM * 2 * N_FREQ     # 24
HIDDEN = 32
OUT_DIM = 4
N_POINTS = 1024                   # number of points
NUM_TILES = 2                     # >=2 tiles -> both v7x TCs work; use 1 on
                                  # single-TC v5e/v6e to halve per-step overhead


def _fused_kernel(x_ref, w1a_ref, w2_ref, b2_ref, w3_ref, b3_ref, o_ref):
    x = x_ref[...]                                  # (IN_DIM, T), points on lanes
    t = x.shape[-1]

    # ---- frequency encoding via double-angle recurrence ---------------------
    # Transcendentals only on the 3 base-frequency rows; octaves 2^1..2^3 are
    # pure VPU FMAs:  sin(2a) = 2*s*c ,  cos(2a) = 1 - 2*s*s.
    theta = x * math.pi                             # (3, T)
    s = jnp.sin(theta)
    c = jnp.cos(theta)
    blocks = [s, c]
    for _ in range(N_FREQ - 1):
        s, c = 2.0 * s * c, 1.0 - 2.0 * s * s
        blocks.append(s)
        blocks.append(c)
    # Row order matches the reference encoding (per freq: [sin rows, cos rows]).
    # Trailing ones row folds the layer-1 bias into the first matmul.
    enc = jnp.concatenate(blocks + [jnp.ones((1, t), jnp.float32)], axis=0)  # (25, T)

    # ---- MLP in transposed form: h^T = W^T @ x^T (+ bias column) ------------
    h = jnp.dot(w1a_ref[...], enc, preferred_element_type=jnp.float32)       # (H, T)
    h = jnp.maximum(h, 0.0)
    h = jnp.dot(w2_ref[...], h, preferred_element_type=jnp.float32) + b2_ref[...]
    h = jnp.maximum(h, 0.0)
    out = jnp.dot(w3_ref[...], h, preferred_element_type=jnp.float32) + b3_ref[...]
    o_ref[...] = out.astype(o_ref.dtype)            # (OUT_DIM, T), lane-dense store


def network_with_input_encoding(x, params, num_tiles=NUM_TILES):
    """x: (N, IN_DIM) float32. Returns (N, OUT_DIM) float32."""
    w1, b1, w2, b2, w3, b3 = params
    n = x.shape[0]
    assert n % num_tiles == 0
    tile_n = n // num_tiles
    assert tile_n % 128 == 0, "points-per-tile must be lane-dense"

    # Layout plumbing (wrapper-side, free): feature-major views so the point
    # dimension rides the 128-lane axis inside the kernel.
    x_t = x.T                                        # (IN_DIM, N)
    w1a = jnp.concatenate([w1.T, b1.T], axis=1)      # (HIDDEN, ENC_DIM+1), b1 folded
    w2t, w3t = w2.T, w3.T                            # (out_features, in_features)
    b2c, b3c = b2.T, b3.T                            # (out_features, 1)

    full = lambda arr: pl.BlockSpec(arr.shape, lambda i: (0,) * arr.ndim)

    out_t = pl.pallas_call(
        _fused_kernel,
        out_shape=jax.ShapeDtypeStruct((OUT_DIM, n), jnp.float32),
        grid_spec=pltpu.PrefetchScalarGridSpec(
            num_scalar_prefetch=0,
            grid=(num_tiles,),
            in_specs=[
                pl.BlockSpec((IN_DIM, tile_n), lambda i: (0, i)),
                full(w1a), full(w2t), full(b2c), full(w3t), full(b3c),
            ],
            out_specs=pl.BlockSpec((OUT_DIM, tile_n), lambda i: (0, i)),
        ),
        compiler_params=pltpu.CompilerParams(
            dimension_semantics=("parallel",)),
    )(x_t, w1a, w2t, b2c, w3t, b3c)

    return out_t.T                                   # (N, OUT_DIM)


def _encode_ref(x):
    """Reference encoding of (N, 3) -> (N, ENC_DIM): per freq i -> [sin, cos]."""
    feats = []
    for i in range(N_FREQ):
        scaled = x * (math.pi * (2.0 ** i))
        feats.append(jnp.sin(scaled))
        feats.append(jnp.cos(scaled))
    return jnp.concatenate(feats, axis=-1)


def _reference(x, params):
    """Pure-JAX reference of encoding + MLP forward."""
    w1, b1, w2, b2, w3, b3 = params
    enc = _encode_ref(x)
    h = jnp.maximum(enc @ w1 + b1, 0.0)
    h = jnp.maximum(h @ w2 + b2, 0.0)
    return h @ w3 + b3


def _init_params(key):
    """Deterministic synthetic weights (Kaiming-ish uniform like nn.Linear)."""
    ks = jax.random.split(key, 6)

    def lin(kw, kb, fan_in, fan_out):
        bound = 1.0 / math.sqrt(fan_in)
        w = jax.random.uniform(kw, (fan_in, fan_out), jnp.float32, -bound, bound)
        b = jax.random.uniform(kb, (1, fan_out), jnp.float32, -bound, bound)
        return w, b

    w1, b1 = lin(ks[0], ks[1], ENC_DIM, HIDDEN)
    w2, b2 = lin(ks[2], ks[3], HIDDEN, HIDDEN)
    w3, b3 = lin(ks[4], ks[5], HIDDEN, OUT_DIM)
    return (w1, b1, w2, b2, w3, b3)


if __name__ == "__main__":
    key = jax.random.PRNGKey(0)
    kx, kp = jax.random.split(key)
    x = jax.random.uniform(kx, (N_POINTS, IN_DIM), jnp.float32)  # points in [0,1)
    params = _init_params(kp)

    out = network_with_input_encoding(x, params)
    out = jax.block_until_ready(out)

    ref = _reference(x, params)
    assert out.shape == (N_POINTS, OUT_DIM)
    assert jnp.allclose(out, ref, atol=1e-3, rtol=1e-3), "mismatch vs reference"

    print("KERNEL_OK")
</pallas_src>

<mosaic_0001>
module attributes {stable_mosaic.version = 11 : i64} {
  func.func @_fused_kernel(%arg0: i32, %arg1: memref<3x512xf32, #tpu.memory_space<vmem>>, %arg2: memref<32x25xf32, #tpu.memory_space<vmem>>, %arg3: memref<32x32xf32, #tpu.memory_space<vmem>>, %arg4: memref<32x1xf32, #tpu.memory_space<vmem>>, %arg5: memref<4x32xf32, #tpu.memory_space<vmem>>, %arg6: memref<4x1xf32, #tpu.memory_space<vmem>>, %arg7: memref<4x512xf32, #tpu.memory_space<vmem>>) attributes {dimension_semantics = [#tpu.dimension_semantics<parallel>], iteration_bounds = array<i64: 2>, scalar_prefetch = 0 : i64, scratch_operands = 0 : i64, tpu.core_type = #tpu.core_type<tc>, window_params = [{transform_indices = @transform_0, window_bounds = array<i64: 3, 512>}, {pipeline_mode = #tpu.pipeline_mode<synchronous>, transform_indices = @transform_1, window_bounds = array<i64: 32, 25>}, {pipeline_mode = #tpu.pipeline_mode<synchronous>, transform_indices = @transform_2, window_bounds = array<i64: 32, 32>}, {pipeline_mode = #tpu.pipeline_mode<synchronous>, transform_indices = @transform_3, window_bounds = array<i64: 32, 1>}, {pipeline_mode = #tpu.pipeline_mode<synchronous>, transform_indices = @transform_4, window_bounds = array<i64: 4, 32>}, {pipeline_mode = #tpu.pipeline_mode<synchronous>, transform_indices = @transform_5, window_bounds = array<i64: 4, 1>}, {transform_indices = @transform_6, window_bounds = array<i64: 4, 512>}]} {
    %c0 = arith.constant 0 : index
    %c0_0 = arith.constant 0 : index
    %0 = vector.load %arg1[%c0, %c0_0] : memref<3x512xf32, #tpu.memory_space<vmem>>, vector<3x512xf32>
    %cst = arith.constant 3.14159274 : f32
    %1 = vector.broadcast %cst : f32 to vector<3x512xf32>
    %2 = arith.mulf %0, %1 : vector<3x512xf32>
    %3 = math.sin %2 : vector<3x512xf32>
    %4 = math.cos %2 : vector<3x512xf32>
    %cst_1 = arith.constant 2.000000e+00 : f32
    %5 = vector.broadcast %cst_1 : f32 to vector<3x512xf32>
    %6 = arith.mulf %5, %3 : vector<3x512xf32>
    %7 = arith.mulf %6, %4 : vector<3x512xf32>
    %cst_2 = arith.constant 2.000000e+00 : f32
    %8 = vector.broadcast %cst_2 : f32 to vector<3x512xf32>
    %9 = arith.mulf %8, %3 : vector<3x512xf32>
    %10 = arith.mulf %9, %3 : vector<3x512xf32>
    %cst_3 = arith.constant 1.000000e+00 : f32
    %11 = vector.broadcast %cst_3 : f32 to vector<3x512xf32>
    %12 = arith.subf %11, %10 : vector<3x512xf32>
    %cst_4 = arith.constant 2.000000e+00 : f32
    %13 = vector.broadcast %cst_4 : f32 to vector<3x512xf32>
    %14 = arith.mulf %13, %7 : vector<3x512xf32>
    %15 = arith.mulf %14, %12 : vector<3x512xf32>
    %cst_5 = arith.constant 2.000000e+00 : f32
    %16 = vector.broadcast %cst_5 : f32 to vector<3x512xf32>
    %17 = arith.mulf %16, %7 : vector<3x512xf32>
    %18 = arith.mulf %17, %7 : vector<3x512xf32>
    %cst_6 = arith.constant 1.000000e+00 : f32
    %19 = vector.broadcast %cst_6 : f32 to vector<3x512xf32>
    %20 = arith.subf %19, %18 : vector<3x512xf32>
    %cst_7 = arith.constant 2.000000e+00 : f32
    %21 = vector.broadcast %cst_7 : f32 to vector<3x512xf32>
    %22 = arith.mulf %21, %15 : vector<3x512xf32>
    %23 = arith.mulf %22, %20 : vector<3x512xf32>
    %cst_8 = arith.constant 2.000000e+00 : f32
    %24 = vector.broadcast %cst_8 : f32 to vector<3x512xf32>
    %25 = arith.mulf %24, %15 : vector<3x512xf32>
    %26 = arith.mulf %25, %15 : vector<3x512xf32>
    %cst_9 = arith.constant 1.000000e+00 : f32
    %27 = vector.broadcast %cst_9 : f32 to vector<3x512xf32>
    %28 = arith.subf %27, %26 : vector<3x512xf32>
    %cst_10 = arith.constant 1.000000e+00 : f32
    %29 = vector.broadcast %cst_10 : f32 to vector<1x512xf32>
    %30 = tpu.concatenate %3, %4, %7, %12, %15, %20, %23, %28, %29 in 0 : vector<3x512xf32>, vector<3x512xf32>, vector<3x512xf32>, vector<3x512xf32>, vector<3x512xf32>, vector<3x512xf32>, vector<3x512xf32>, vector<3x512xf32>, vector<1x512xf32> -> vector<25x512xf32>
    %c0_11 = arith.constant 0 : index
    %c0_12 = arith.constant 0 : index
    %31 = vector.load %arg2[%c0_11, %c0_12] : memref<32x25xf32, #tpu.memory_space<vmem>>, vector<32x25xf32>
    %cst_13 = arith.constant dense<0.000000e+00> : vector<32x512xf32>
    %32 = tpu.matmul %31, %30, %cst_13 {dimension_numbers = #tpu.dot_dimension_numbers<[1], [0], [0], [1], [0, 0, 1, 1], [], []>} : vector<32x25xf32>, vector<25x512xf32>, vector<32x512xf32> -> vector<32x512xf32>
    %cst_14 = arith.constant 0.000000e+00 : f32
    %33 = vector.broadcast %cst_14 : f32 to vector<32x512xf32>
    %34 = arith.maximumf %32, %33 : vector<32x512xf32>
    %c0_15 = arith.constant 0 : index
    %c0_16 = arith.constant 0 : index
    %35 = vector.load %arg3[%c0_15, %c0_16] : memref<32x32xf32, #tpu.memory_space<vmem>>, vector<32x32xf32>
    %cst_17 = arith.constant dense<0.000000e+00> : vector<32x512xf32>
    %36 = tpu.matmul %35, %34, %cst_17 {dimension_numbers = #tpu.dot_dimension_numbers<[1], [0], [0], [1], [0, 0, 1, 1], [], []>} : vector<32x32xf32>, vector<32x512xf32>, vector<32x512xf32> -> vector<32x512xf32>
    %c0_18 = arith.constant 0 : index
    %c0_19 = arith.constant 0 : index
    %37 = vector.load %arg4[%c0_18, %c0_19] : memref<32x1xf32, #tpu.memory_space<vmem>>, vector<32x1xf32>
    %38 = vector.broadcast %37 : vector<32x1xf32> to vector<32x512xf32>
    %39 = arith.addf %36, %38 : vector<32x512xf32>
    %cst_20 = arith.constant 0.000000e+00 : f32
    %40 = vector.broadcast %cst_20 : f32 to vector<32x512xf32>
    %41 = arith.maximumf %39, %40 : vector<32x512xf32>
    %c0_21 = arith.constant 0 : index
    %c0_22 = arith.constant 0 : index
    %42 = vector.load %arg5[%c0_21, %c0_22] : memref<4x32xf32, #tpu.memory_space<vmem>>, vector<4x32xf32>
    %cst_23 = arith.constant dense<0.000000e+00> : vector<4x512xf32>
    %43 = tpu.matmul %42, %41, %cst_23 {dimension_numbers = #tpu.dot_dimension_numbers<[1], [0], [0], [1], [0, 0, 1, 1], [], []>} : vector<4x32xf32>, vector<32x512xf32>, vector<4x512xf32> -> vector<4x512xf32>
    %c0_24 = arith.constant 0 : index
    %c0_25 = arith.constant 0 : index
    %44 = vector.load %arg6[%c0_24, %c0_25] : memref<4x1xf32, #tpu.memory_space<vmem>>, vector<4x1xf32>
    %45 = vector.broadcast %44 : vector<4x1xf32> to vector<4x512xf32>
    %46 = arith.addf %43, %45 : vector<4x512xf32>
    %c0_26 = arith.constant 0 : index
    %c0_27 = arith.constant 0 : index
    %47 = vector.load %arg7[%c0_26, %c0_27] : memref<4x512xf32, #tpu.memory_space<vmem>>, vector<4x512xf32>
    tpu.vector_store %arg7[%c0_26, %c0_27], %46 {strides = array<i32>} : memref<4x512xf32, #tpu.memory_space<vmem>>, vector<4x512xf32>,
    return
  }
  func.func @transform_0(%arg0: i32) -> (i32, i32) {
    %c0_i32 = arith.constant 0 : i32
    %c0_i32_0 = arith.constant 0 : i32
    return %c0_i32, %arg0 : i32, i32
  }
  func.func @transform_1(%arg0: i32) -> (i32, i32) {
    %c0_i32 = arith.constant 0 : i32
    %c0_i32_0 = arith.constant 0 : i32
    %c0_i32_1 = arith.constant 0 : i32
    return %c0_i32, %c0_i32_0 : i32, i32
  }
  func.func @transform_2(%arg0: i32) -> (i32, i32) {
    %c0_i32 = arith.constant 0 : i32
    %c0_i32_0 = arith.constant 0 : i32
    %c0_i32_1 = arith.constant 0 : i32
    return %c0_i32, %c0_i32_0 : i32, i32
  }
  func.func @transform_3(%arg0: i32) -> (i32, i32) {
    %c0_i32 = arith.constant 0 : i32
    %c0_i32_0 = arith.constant 0 : i32
    %c0_i32_1 = arith.constant 0 : i32
    return %c0_i32, %c0_i32_0 : i32, i32
  }
  func.func @transform_4(%arg0: i32) -> (i32, i32) {
    %c0_i32 = arith.constant 0 : i32
    %c0_i32_0 = arith.constant 0 : i32
    %c0_i32_1 = arith.constant 0 : i32
    return %c0_i32, %c0_i32_0 : i32, i32
  }
  func.func @transform_5(%arg0: i32) -> (i32, i32) {
    %c0_i32 = arith.constant 0 : i32
    %c0_i32_0 = arith.constant 0 : i32
    %c0_i32_1 = arith.constant 0 : i32
    return %c0_i32, %c0_i32_0 : i32, i32
  }
  func.func @transform_6(%arg0: i32) -> (i32, i32) {
    %c0_i32 = arith.constant 0 : i32
    %c0_i32_0 = arith.constant 0 : i32
    return %c0_i32, %arg0 : i32, i32
  }
}

</mosaic_0001>

<bundles_post_ra>
// kernel: tpu_custom_call.1
= control target key start
LH: loop header
LB: loop body
LE: loop exit
PB: predicated region body
PF: predicated region fallthrough
CT: control target
= control target key end

     0   :  { %11 = vsyncpa [#allocation3], 0  ;;  %s2206_s0 = inlined_call_operand.vmem [shape: f32[3,1024], index: 0, kind: input, shape index: {}]   ;;  %s2207_s1 = inlined_call_operand.hbm [shape: f32[32,25], index: 1, kind: input, shape index: {}]   ;;  %s2208_s2 = inlined_call_operand.hbm [shape: f32[32,32], index: 2, kind: input, shape index: {}]   ;;  %s2209_s3 = inlined_call_operand.vmem [shape: f32[32,1], index: 3, kind: input, shape index: {}]   ;;  %s2210_s4 = inlined_call_operand.vmem [shape: f32[4,32], index: 4, kind: input, shape index: {}]   ;;  %s2211_s5 = inlined_call_operand.vmem [shape: f32[4,1], index: 5, kind: input, shape index: {}]   ;;  %s2212_s6 = inlined_call_operand.hbm [shape: f32[4,1024], index: 6, kind: output, shape index: {}]  }
   0x1   :  { %12 = vsyncpa [#allocation6], 0 }
   0x2   :  { %13 = vsyncpa [#allocation4], 0 }
   0x3   :  { %15 = vsyncpa [#allocation4 + $0x1], 0  ;;  %s1866_s21 = smov 0   ;;  %s1868_s22 = smov 0  }
   0x4   :  { %s1870_s23 = smov 0   ;;  %s1872_s24 = smov 0  }
   0x5 LB: > { %s1887_s25 = sadd.s32 4294967295, %s1815_s24   ;;  %s1551_s26 = sadd.s32 4294967294, %s1815_s24   ;;  %s1815_s24 = sphi %s1872_s24, %s2226_s24   ;;  %s1811_s23 = sphi %s1870_s23, %s2225_s23   ;;  %s1807_s22 = sphi %s1868_s22, %s2224_s22   ;;  %s1803_s21 = sphi %s1866_s21, %s2223_s21  }
   0x6   : > { %s1891_s27 = sadd.s32 1, %s1815_s24   ;;  %s159_s28 = sadd.s32 1, %s1811_s23 }
   0x7   : > { %s156_s29 = ssub.s32 %s1815_s24, %s1891_s27  ;;  %p169_p0 = scmp.ne.s32.totalorder %s1811_s23, %s1807_s22 }
   0x8   : > { %p157_p1 = scmp.eq.s32.totalorder %s156_s29, 0  ;;  %p170_p2 = scmp.eq.s32.totalorder %s1887_s25, 1 }
   0x9   : > { %p175_p3 = scmp.ne.s32.totalorder %s1807_s22, %s1803_s21  ;;  %p176_p4 = scmp.eq.s32.totalorder %s1551_s26, 1 }
   0xa   : > { %s1902_s30 = scalar_select %p157_p1, %s1811_s23, %s159_s28  }
   0xb   : > { %p1904_p5 = por %p170_p2, %p169_p0  ;;  %p1908_p6 = por %p176_p4, %p175_p3 }
   0xc   : > { %p1552_p7 = scmp.ge.s32.totalorder %s1815_s24, 1  ;;  %p183_p8 = scmp.lt.s32.totalorder %s1815_s24, 3 }
   0xd   : > { %s2215_s8 = scalar_select %p1908_p6, 1, 0 }
   0xe   : > { %p2213_p9 = scmp.eq.s32.totalorder %s1887_s25, 0  ;;  %p1915_p10 = pnand %p1552_p7, %p183_p8 }
   0xf   : > { %s1817_s10 = smov [#allocation2]   ;;  %s1818_s13 = smov [#allocation5]  }
  0x10   : > { %s195_s11 = sshll.u32 %s1817_s10, 4  ;;  %p1624_p11 = pneg %p1915_p10  ;;  %s196_s11 = int_to_ptr.vmem [resolvable:$true] %s195_s11 }
  0x11   : > { %s208_s14 = sshll.u32 %s1818_s13, 4  ;;  %s1706_s15 = scalar_lea.vmem %s196_s11, 512  ;;  %s209_s14 = int_to_ptr.vmem [resolvable:$true] %s208_s14 }
  0x12   : > { %p1923_p12 = pnand %p2213_p9, %p1624_p11  ;;  %p1707_p0 = scmp.ne.s32.totalorder %s196_s11, %s1706_s15 }
  0x13   : > { %p1714_p3 = scmp.lt.s32.totalorder %s196_s11, %s196_s11  ;;  %p1715_p4 = scmp.lt.s32.totalorder %s1706_s15, %s1706_s15 }
  0x14   : > { %p1697_p13 = pneg %p1923_p12 }
  0x15   : > { %p1716_p7 = por %p1715_p4, %p1714_p3 }
  0x16   : > { %p1709_p1 = pnand %p1707_p0, %p1697_p13 }
  0x18   : > { %p1710_p2 = pneg %p1709_p1 }
  0x1a   : > { %p1717_p8 = pnand %p1716_p7, %p1710_p2 }
  0x1c   : > { %1720 = shalt.err (!%p1717_p8)
}
  0x1d   : > { %s1819_s16 = smov 128   ;;  %s1820_s17 = smov 8  }
  0x1e   : > { %1627 = dma.hbm_to_vmem [thread:$0]  (!%p1923_p12), %s2207_s1, 512, %s196_s11, [#allocation3], %s1819_s16, %s1819_s16, %s1820_s17  }
  0x1f   : > { %s1732_s20 = scalar_lea.vmem %s209_s14, 512  ;;  %p1740_p9 = scmp.lt.s32.totalorder %s209_s14, %s209_s14 }
  0x20   : > { %p1733_p11 = scmp.ne.s32.totalorder %s209_s14, %s1732_s20  ;;  %p1741_p6 = scmp.lt.s32.totalorder %s1732_s20, %s1732_s20 }
  0x22   : > { %p1735_p0 = pnand %p1733_p11, %p1697_p13  ;;  %p1742_p3 = por %p1741_p6, %p1740_p9 }
  0x24   : > { %p1736_p1 = pneg %p1735_p0 }
  0x26   : > { %p1743_p2 = pnand %p1742_p3, %p1736_p1 }
  0x28   : > { %1746 = shalt.err (!%p1743_p2)
}
  0x29   : > { %1630 = dma.hbm_to_vmem [thread:$0]  (!%p1923_p12), %s2208_s2, 512, %s209_s14, [#allocation6], %s1819_s16, %s1819_s16, %s1820_s17  }
  0x2a   : > { %242 = sbr.rel (%p1915_p10) target bundleno = 827 (0x33b), region = 44  ;;  %p2218_p4 = scmp.eq.s32.totalorder (!%p1915_p10), %s1887_s25, 0 }
  0x2f   : > { %1790 = dma.done.wait (%p2218_p4), [#allocation3], 512   ;;  %p2219_p13 = pmov %p2218_p4 }
  0x30   : > { %p2220_p7 = pmov %p2218_p4 }
  0x31   : > { %1792 = vsyncadd (%p2219_p13), [#allocation3], 4294966784 }
  0x32   : > { %1794 = dma.done.wait (%p2220_p7), [#allocation6], 512   ;;  %p2221_p6 = pmov %p2218_p4 }
  0x33   : > { %vm819_vm0 = vcmask 1040384   ;;  %s1560_s29 = sshll.u32 %s1887_s25, 2  ;;  %v1821_v0 = vmov 1.0   ;;  %v1822_v1 = vmov 0.0   ;;  %v1823_v28 = vmov 683565275  }
  0x34   : > { %1796 = vsyncadd (%p2221_p6), [#allocation6], 4294966784  ;;  %1578 = vmatprep.subr.msk.mxu0 %vm819_vm0, %v1821_v0  ;;  %1584 = vmatprep.subr.msk.mxu1 %vm819_vm0, %v1821_v0  ;;  %p277_p9 = scmp.lt.s32.totalorder %s1560_s29, 7  ;;  %v1824_v30 = vmov 2475754826   ;;  %s273_s10 = sand.u32 1, %s1807_s22  }
  0x35   : > { %1579 = vmatpush1.msk.msra.mxu0 %vm819_vm0, %v1821_v0  ;;  %1585 = vmatpush1.msk.msra.mxu1 %vm819_vm0, %v1821_v0  ;;  %v1825_v32 = vmov 2131351028   ;;  %v1826_v34 = vmov 2102212464   ;;  %v1827_v36 = vmov 920167782  }
  0x36   : > { %s2228_s29 = smov (!%p277_p9, %s1560_s29), 7  ;;  %928 = vmatprep.mubr.f32.mxu0 %v1822_v1  ;;  %1017 = vmatprep.mubr.f32.mxu1 %v1822_v1  ;;  %v1828_v44 = vmov 1326507024   ;;  %s1559_s11 = sshll.u32 %s273_s10, 4 }
  0x37   : > { %s1561_s9 = sshll.u32 %s2228_s29, 2  ;;  %s1605_s13 = sshll.u32 %s1887_s25, 8 }
  0x38   : > { %s280_s12 = scalar_lea.vmem %s2206_s0, %s1561_s9  ;;  %s1468_s17 = scalar_lea.hbm %s2212_s6, %s1605_s13 }
  0x39   : > { %v283_v2 = vld [vmem:[%s280_s12] sm:$0x77]  ;;  %v284_v3 = vld [vmem:[%s280_s12 + $0x8] sm:$0x77]  ;;  %s275_s12 = scalar_lea.vmem [#allocation7], %s1559_s11  ;;  %s1456_s18 = scalar_lea.sflag [#allocation4], %s273_s10 }
  0x3a   : > { %v1965_v4 = vmul.f32 3.1415927, %v283_v2  ;;  %v1967_v5 = vmul.f32 3.1415927, %v284_v3  ;;  %s1470_s14 = sshll.u32 %s275_s12, 4  ;;  %s1830_s20 = smov [#allocation7]   ;;  %s1471_s14 = int_to_ptr.vmem [resolvable:$true] %s1470_s14 }
  0x3b   : > { %s1747_s19 = scalar_lea.vmem %s1471_s14, 256  ;;  %s1751_s26 = sshll.u32 %s1830_s20, 4  ;;  %s1752_s26 = int_to_ptr.vmem [resolvable:$false] %s1751_s26 }
  0x3c   : > { %v287_v6 = vand.u32 2147483647, %v1965_v4  ;;  %v290_v7 = vand.u32 2139095040, %v1965_v4  ;;  %v391_v8 = vand.u32 2147483647, %v1967_v5  ;;  %v394_v9 = vand.u32 2139095040, %v1967_v5  ;;  %p1748_p10 = scmp.ne.s32.totalorder %s1471_s14, %s1747_s19  ;;  %p1754_p11 = scmp.lt.s32.totalorder %s1471_s14, %s1752_s26 }
  0x3d   : > { %vm289_vm15 = vcmp.lt.s32.totalorder %v1965_v4, 0  ;;  %s1753_s25 = scalar_lea.vmem %s1752_s26, 512 }
  0x3e   : > { %v291_v10 = vshrl.u32 %v290_v7, 23  ;;  %v294_v11 = vand.u32 8388607, %v287_v6  ;;  %v395_v12 = vshrl.u32 %v394_v9, 23  ;;  %v398_v13 = vand.u32 8388607, %v391_v8  ;;  %p1749_p12 = pnand %p1748_p10, %p1904_p5  ;;  %p1755_p0 = scmp.lt.s32.totalorder %s1753_s25, %s1747_s19 }
  0x40   : > { %v1562_v14 = vadd.s32 4294967169, %v291_v10  ;;  %v1566_v15 = vadd.s32 4294967169, %v395_v12  ;;  %v295_v17 = vor.u32 8388608, %v294_v11  ;;  %v399_v18 = vor.u32 8388608, %v398_v13  ;;  %p1750_p8 = pneg %p1749_p12  ;;  %p1756_p1 = por %p1755_p0, %p1754_p11 }
  0x42   : > { %v297_v16 = vadd.s32 1, %v1562_v14  ;;  %v401_v19 = vadd.s32 1, %v1566_v15  ;;  %v1977_v24 = vshll.u32 %v295_v17, 8  ;;  %v1979_v26 = vshll.u32 %v399_v18, 8  ;;  %p1757_p3 = pnand %p1756_p1, %p1750_p8 }
  0x44   : > { %vm298_vm1 = vcmp.gt.s32.totalorder %v297_v16, 0  ;;  %vm402_vm2 = vcmp.gt.s32.totalorder %v401_v19, 0 }
  0x45   : > { %v299_v20 = vsel %vm298_vm1, %v297_v16, 0  ;;  %v403_v23 = vsel %vm402_vm2, %v401_v19, 0  ;;  %vm288_vm1 = vcmp.le.f32.partialorder %v287_v6, 0.7853982  ;;  %vm393_vm2 = vcmp.lt.s32.totalorder %v1967_v5, 0 }
  0x46   : > { %v300_v21 = vshrl.u32 %v299_v20, 5  ;;  %v301_v22 = vand.u32 31, %v299_v20  ;;  %v405_v25 = vand.u32 31, %v403_v23  ;;  %v1981_v38 = vshrl.u32 %v403_v23, 5 }
  0x48   : > { %v302_v27 = vsub.s32 32, %v301_v22  ;;  %v304_v29 = vshll.u32 %v1823_v28, %v301_v22  ;;  %v307_v31 = vshll.u32 %v1824_v30, %v301_v22  ;;  %v310_v33 = vshll.u32 %v1825_v32, %v301_v22 }
  0x49   : > { %v313_v35 = vshll.u32 %v1826_v34, %v301_v22  ;;  %v316_v37 = vshll.u32 %v1827_v36, %v301_v22  ;;  %vm319_vm3 = vcmp.lt.s32.totalorder %v300_v21, 1  ;;  %vm320_vm4 = vcmp.lt.s32.totalorder %v300_v21, 2 }
  0x4a   : > { %v303_v39 = vshrl.u32 %v1823_v28, %v302_v27  ;;  %v305_v40 = vshrl.u32 %v1824_v30, %v302_v27  ;;  %v308_v41 = vshrl.u32 %v1825_v32, %v302_v27  ;;  %v311_v42 = vshrl.u32 %v1826_v34, %v302_v27 }
  0x4b   : > { %v314_v43 = vshrl.u32 %v1827_v36, %v302_v27  ;;  %v317_v45 = vshrl.u32 %v1828_v44, %v302_v27  ;;  %vm322_vm5 = vcmp.lt.s32.totalorder %v300_v21, 4  ;;  %v406_v49 = vsub.s32 32, %v405_v25 }
  0x4c   : > { %v306_v46 = vor.u32 %v305_v40, %v304_v29  ;;  %v309_v47 = vor.u32 %v308_v41, %v307_v31  ;;  %v312_v48 = vor.u32 %v311_v42, %v310_v33  ;;  %vm321_vm6 = vcmp.lt.s32.totalorder %v300_v21, 3 }
  0x4d   : > { %v315_v50 = vor.u32 %v314_v43, %v313_v35  ;;  %v318_v51 = vor.u32 %v317_v45, %v316_v37  ;;  %v408_v52 = vshll.u32 %v1823_v28, %v405_v25  ;;  %v411_v60 = vshll.u32 %v1824_v30, %v405_v25 }
  0x4e   : > { %v323_v53 = vsel %vm319_vm3, %v303_v39, %v306_v46  ;;  %v324_v54 = vsel %vm322_vm5, %v312_v48, 2102212464  ;;  %v327_v55 = vsel %vm319_vm3, %v306_v46, %v309_v47  ;;  %v331_v56 = vsel %vm319_vm3, %v309_v47, %v312_v48 }
  0x4f   : > { %v325_v57 = vsel %vm321_vm6, %v309_v47, %v324_v54  ;;  %v328_v58 = vsel %vm322_vm5, %v315_v50, 920167782  ;;  %v332_v59 = vsel %vm322_vm5, %v318_v51, 1326507024  ;;  %v407_v63 = vshrl.u32 %v1823_v28, %v406_v49 }
  0x50   : > { %v329_v61 = vsel %vm321_vm6, %v312_v48, %v328_v58  ;;  %v333_v62 = vsel %vm321_vm6, %v315_v50, %v332_v59  ;;  %v409_v0 = vshrl.u32 %v1824_v30, %v406_v49  ;;  %v326_v2 = vsel %vm320_vm4, %v323_v53, %v325_v57 }
  0x51   : > { %v330_v3 = vsel %vm320_vm4, %v327_v55, %v329_v61  ;;  %v334_v7 = vsel %vm320_vm4, %v331_v56, %v333_v62  ;;  %v412_v9 = vshrl.u32 %v1825_v32, %v406_v49  ;;  %v414_v16 = vshll.u32 %v1825_v32, %v405_v25 }
  0x52   : > { %v1990_v10 = vmul.u32.u64.low %v1977_v24, %v334_v7  ;;  %v1991_v11 = vmul.u32.u64.high %v1977_v24, %v334_v7, %v1990_v10  ;;  %v1994_v12 = vmul.u32.u64.low %v1977_v24, %v330_v3  ;;  %v1995_v13 = vmul.u32.u64.high %v1977_v24, %v330_v3, %v1994_v12 }
  0x53   : > { %v410_v14 = vor.u32 %v409_v0, %v408_v52  ;;  %v413_v15 = vor.u32 %v412_v9, %v411_v60  ;;  %v415_v17 = vshrl.u32 %v1826_v34, %v406_v49  ;;  %v417_v18 = vshll.u32 %v1826_v34, %v405_v25 }
  0x54   : > { %v418_v19 = vshrl.u32 %v1827_v36, %v406_v49  ;;  %v420_v20 = vshll.u32 %v1827_v36, %v405_v25  ;;  %v421_v22 = vshrl.u32 %v1828_v44, %v406_v49  ;;  %v342_v21 = vmul.u32 %v1977_v24, %v326_v2 }
  0x55   : > { %v416_v23 = vor.u32 %v415_v17, %v414_v16  ;;  %vm423_vm7 = vcmp.lt.s32.totalorder %v1981_v38, 1  ;;  %vm424_vm8 = vcmp.lt.s32.totalorder %v1981_v38, 2  ;;  %vm344_vm9 = vc.u32 %v1991_v11, %v1994_v12 }
  0x56   : > { %v345_v27 = vadd.s32 1, %v1995_v13  ;;  %v419_v28 = vor.u32 %v418_v19, %v417_v18  ;;  %vm425_vm10 = vcmp.lt.s32.totalorder %v1981_v38, 3  ;;  %v422_v29 = vor.u32 %v421_v22, %v420_v20 }
  0x57   : > { %vm426_vm11 = vcmp.lt.s32.totalorder %v1981_v38, 4  ;;  %v427_v30 = vsel %vm423_vm7, %v407_v63, %v410_v14  ;;  %v431_v25 = vsel %vm423_vm7, %v410_v14, %v413_v15  ;;  %v435_v33 = vsel %vm423_vm7, %v413_v15, %v416_v23 }
  0x58   : > { %v346_v31 = vsel %vm344_vm9, %v345_v27, %v1995_v13  ;;  %v428_v24 = vsel %vm426_vm11, %v416_v23, 2102212464  ;;  %v432_v32 = vsel %vm426_vm11, %v419_v28, 920167782  ;;  %v436_v37 = vsel %vm426_vm11, %v422_v29, 1326507024 }
  0x59   : > { %v347_v34 = vadd.s32 %v346_v31, %v342_v21  ;;  %v429_v35 = vsel %vm425_vm10, %v413_v15, %v428_v24  ;;  %v433_v36 = vsel %vm425_vm10, %v416_v23, %v432_v32  ;;  %v437_v41 = vsel %vm425_vm10, %v419_v28, %v436_v37 }
  0x5a   : > { %v430_v39 = vsel %vm424_vm8, %v427_v30, %v429_v35  ;;  %v434_v40 = vsel %vm424_vm8, %v431_v25, %v433_v36  ;;  %v438_v43 = vsel %vm424_vm8, %v435_v33, %v437_v41  ;;  %v343_v62 = vadd.s32 %v1994_v12, %v1991_v11 }
  0x5b   : > { %v348_v42 = vadd.s32 536870912, %v347_v34  ;;  %v2012_v44 = vmul.u32.u64.low %v1979_v26, %v434_v40  ;;  %v2013_v45 = vmul.u32.u64.high %v1979_v26, %v434_v40, %v2012_v44  ;;  %v446_v49 = vmul.u32 %v1979_v26, %v430_v39 }
  0x5c   : > { %v2016_v46 = vmul.u32.u64.low %v1979_v26, %v438_v43  ;;  %v2017_v47 = vmul.u32.u64.high %v1979_v26, %v438_v43, %v2016_v46  ;;  %vm392_vm3 = vcmp.le.f32.partialorder %v391_v8, 0.7853982  ;;  %vm379_vm10 = vweird.f32 %v1965_v4 }
  0x5d   : > { %v349_v48 = vshrl.u32 %v348_v42, 30  ;;  %v449_v51 = vadd.s32 1, %v2013_v45  ;;  %vm483_vm11 = vweird.f32 %v1967_v5 }
  0x5e   : > { %vm448_vm12 = vc.u32 %v2017_v47, %v2012_v44  ;;  %v447_v19 = vadd.s32 %v2012_v44, %v2017_v47 }
  0x5f   : > { %v350_v50 = vshll.u32 %v349_v48, 30  ;;  %v450_v38 = vsel %vm448_vm12, %v449_v51, %v2013_v45  ;;  %v373_v27 = vsub.s32 4, %v349_v48  ;;  %vm809_vm12 = vcmask 1042432  }
  0x60   : > { %v451_v53 = vadd.s32 %v450_v38, %v446_v49 }
  0x61   : > { %v351_v52 = vsub.s32 %v347_v34, %v350_v50  ;;  %v374_v32 = vsel %vm289_vm15, %v373_v27, %v349_v48 }
  0x62   : > { %v452_v55 = vadd.s32 536870912, %v451_v53  ;;  %v376_v37 = vsel %vm288_vm1, 0, %v374_v32 }
  0x63   : > { %v353_v54 = vsub.s32 0, %v351_v52  ;;  %v380_v41 = vadd.s32 3, %v376_v37  ;;  %v588_v46 = vand.u32 3, %v376_v37 }
  0x64   : > { %v453_v57 = vshrl.u32 %v452_v55, 30 }
  0x65   : > { %v1563_v56 = vmin.u32 %v353_v54, %v351_v52  ;;  %v381_v45 = vand.u32 3, %v380_v41  ;;  %vm593_vm5 = vcmp.eq.s32.totalorder %v588_v46, 2  ;;  %vm590_vm7 = vcmp.eq.s32.totalorder %v588_v46, 0 }
  0x66   : > { %v454_v59 = vshll.u32 %v453_v57, 30  ;;  %v477_v40 = vsub.s32 4, %v453_v57  ;;  %vm589_vm9 = vcmp.lt.s32.totalorder %v588_v46, 2 }
  0x67   : > { %v355_v58 = vclz %v1563_v56  ;;  %vm386_vm4 = vcmp.eq.s32.totalorder %v381_v45, 2  ;;  %vm383_vm6 = vcmp.eq.s32.totalorder %v381_v45, 0  ;;  %vm382_vm8 = vcmp.lt.s32.totalorder %v381_v45, 2 }
  0x68   : > { %v455_v61 = vsub.s32 %v451_v53, %v454_v59  ;;  %v478_v43 = vsel %vm393_vm2, %v477_v40, %v453_v57 }
  0x69   : > { %v1564_v60 = vadd.s32 4294967294, %v355_v58  ;;  %v480_v47 = vsel %vm392_vm3, 0, %v478_v43 }
  0x6a   : > { %v457_v63 = vsub.s32 0, %v455_v61  ;;  %v484_v51 = vadd.s32 3, %v480_v47  ;;  %v691_v55 = vand.u32 3, %v480_v47 }
  0x6b   : > { %vm1565_vm13 = vcmp.lt.s32.totalorder %v1564_v60, 0 }
  0x6c   : > { %v358_v26 = vsel %vm1565_vm13, 0, %v1564_v60  ;;  %v1567_v7 = vmin.u32 %v457_v63, %v455_v61  ;;  %v485_v58 = vand.u32 3, %v484_v51  ;;  %vm692_vm13 = vcmp.lt.s32.totalorder %v691_v55, 2 }
  0x6d   : > { %v359_v0 = vsub.s32 32, %v358_v26  ;;  %v360_v2 = vshll.u32 %v351_v52, %v358_v26  ;;  %v363_v3 = vsub.s32 4294967266, %v358_v26 }
  0x6e   : > { %v459_v13 = vclz %v1567_v7 }
  0x6f   : > { %v361_v9 = vshrl.u32 %v343_v62, %v359_v0  ;;  %v364_v10 = vadd.s32 127, %v363_v3 }
  0x70   : > { %v1568_v16 = vadd.s32 4294967294, %v459_v13 }
  0x71   : > { %v362_v14 = vor.u32 %v361_v9, %v360_v2  ;;  %v365_v15 = vshll.u32 %v364_v10, 23 }
  0x72   : > { %vm1569_vm14 = vcmp.lt.s32.totalorder %v1568_v16, 0 }
  0x73   : > { %v366_v17 = vor.u32 4788187, %v365_v15  ;;  %v369_v18 = vcvt.s32.f32 %v362_v14  ;;  %v462_v11 = vsel %vm1569_vm14, 0, %v1568_v16  ;;  %vm693_vm14 = vcmp.eq.s32.totalorder %v691_v55, 0 }
  0x74   : > { %v463_v12 = vsub.s32 32, %v462_v11  ;;  %v464_v22 = vshll.u32 %v455_v61, %v462_v11  ;;  %v467_v21 = vsub.s32 4294967266, %v462_v11 }
  0x75   : > { %v367_v20 = vand.u32 2147483647, %v366_v17 }
  0x76   : > { %v465_v28 = vshrl.u32 %v447_v19, %v463_v12  ;;  %v468_v29 = vadd.s32 127, %v467_v21 }
  0x77   : > { %v370_v23 = vmul.f32 %v369_v18, %v367_v20 }
  0x78   : > { %v466_v25 = vor.u32 %v465_v28, %v464_v22  ;;  %v469_v31 = vshll.u32 %v468_v29, 23 }
  0x79   : > { %v371_v30 = vxor.u32 2147483648, %v370_v23 }
  0x7a   : > { %v470_v34 = vor.u32 4788187, %v469_v31  ;;  %v473_v35 = vcvt.s32.f32 %v466_v25 }
  0x7b   : > { %v372_v24 = vsel %vm289_vm15, %v371_v30, %v370_v23  ;;  %vm696_vm15 = vcmp.eq.s32.totalorder %v691_v55, 2 }
  0x7c   : > { %v375_v33 = vsel %vm288_vm1, %v1965_v4, %v372_v24  ;;  %v471_v36 = vand.u32 2147483647, %v470_v34  ;;  %vm490_vm1 = vcmp.eq.s32.totalorder %v485_v58, 2 }
  0x7d   : > { %1687 = vcosq.f32 %v375_v33 }
  0x7e   : > { %1689 = vsinq.f32 %v375_v33  ;;  %v474_v39 = vmul.f32 %v473_v35, %v471_v36 }
  0x80   : > { %v475_v6 = vxor.u32 2147483648, %v474_v39 }
  0x82   : > { %v476_v42 = vsel %vm393_vm2, %v475_v6, %v474_v39  ;;  %vm824_vm2 = vcmask 1043456  }
  0x83   : > { %v479_v44 = vsel %vm392_vm3, %v1967_v5, %v476_v42  ;;  %vm834_vm3 = vcmask 1041408  }
  0x84   : > { %1691 = vcosq.f32 %v479_v44 }
  0x85   : > { %1693 = vsinq.f32 %v479_v44 }
  0x8a   : > { %v1688_v48 = vpop.eup %1687 }
  0x8b   : > { %v1690_v49 = vpop.eup %1689  ;;  %v387_v50 = vxor.u32 2147483648, %v1688_v48 }
  0x8c   : > { %v384_v8 = vxor.u32 2147483648, %v1690_v49 }
  0x8d   : > { %v388_v52 = vsel %vm386_vm4, %v387_v50, %v1690_v49  ;;  %v595_v38 = vsel %vm593_vm5, %v387_v50, %v1690_v49  ;;  %vm486_vm4 = vcmp.lt.s32.totalorder %v485_v58, 2  ;;  %vm487_vm5 = vcmp.eq.s32.totalorder %v485_v58, 0 }
  0x8e   : > { %v385_v53 = vsel %vm383_vm6, %v1688_v48, %v384_v8  ;;  %v592_v54 = vsel %vm590_vm7, %v1688_v48, %v384_v8  ;;  %vm829_vm6 = vcmask 1046528   ;;  %vm839_vm7 = vcmask 1044480  }
  0x8f   : > { %v389_v56 = vsel %vm382_vm8, %v385_v53, %v388_v52  ;;  %v596_v57 = vsel %vm589_vm9, %v592_v54, %v595_v38  ;;  %vm814_vm8 = vcmask 1045504   ;;  %vm848_vm9 = vcmask 203776  }
  0x90   : > { %v2034_v59 = vsel %vm379_vm10, nan, %v389_v56  ;;  %v2036_v60 = vsel %vm379_vm10, nan, %v596_v57 }
  0x91   : > { %v701_v61 = vmul.f32 2.0, %v2034_v59  ;;  %v733_v62 = vcombine.high %v2036_v60, %v2036_v60  ;;  %v727_v4 = vcombine.high %v2034_v59, %v2034_v59  ;;  %v1692_v26 = vpop.eup %1691  ;;  %v735_v9 = vrot.slane %v2036_v60, 5 }
  0x92   : > { %v1694_v3 = vpop.eup %1693  ;;  %v491_v7 = vxor.u32 2147483648, %v1692_v26 }
  0x93   : > { %v2045_v63 = vmul.f32 %v701_v61, %v2036_v60  ;;  %v705_v0 = vmul.f32 %v701_v61, %v2034_v59  ;;  %v736_v2 = vrot.slane %v733_v62, 5  ;;  %v488_v14 = vxor.u32 2147483648, %v1694_v3 }
  0x94   : > { %v492_v16 = vsel %vm490_vm1, %v491_v7, %v1694_v3  ;;  %v698_v17 = vsel %vm696_vm15, %v491_v7, %v1694_v3 }
  0x95   : > { %v707_v10 = vsub.f32 1.0, %v705_v0  ;;  %v709_v13 = vmul.f32 2.0, %v2045_v63  ;;  %v745_v15 = vcombine.high %v2045_v63, %v2045_v63  ;;  %v747_v18 = vrot.slane %v2045_v63, 2 }
  0x96   : > { %v2055_v19 = vsel %vm809_vm12, %v727_v4, %v736_v2  ;;  %v489_v12 = vsel %vm487_vm5, %v1692_v26, %v488_v14  ;;  %v695_v22 = vsel %vm693_vm14, %v1692_v26, %v488_v14 }
  0x97   : > { %v711_v20 = vmul.f32 %v709_v13, %v707_v10  ;;  %v713_v11 = vmul.f32 %v709_v13, %v2045_v63  ;;  %v493_v21 = vsel %vm486_vm4, %v489_v12, %v492_v16  ;;  %v699_v23 = vsel %vm692_vm13, %v695_v22, %v698_v17 }
  0x98   : > { %v748_v27 = vrot.slane %v745_v15, 2  ;;  %v757_v28 = vcombine.high %v707_v10, %v707_v10  ;;  %v2063_v25 = vsel %vm483_vm11, nan, %v493_v21  ;;  %v2067_v31 = vsel %vm483_vm11, nan, %v699_v23 }
  0x99   : > { %v715_v29 = vsub.f32 1.0, %v713_v11  ;;  %v717_v30 = vmul.f32 2.0, %v711_v20  ;;  %v702_v24 = vmul.f32 2.0, %v2063_v25  ;;  %v759_v33 = vrot.slane %v707_v10, 7 }
  0x9a   : > { %v760_v32 = vrot.slane %v757_v28, 7  ;;  %v769_v34 = vcombine.low %v711_v20, %v711_v20  ;;  %v816_v11 = vsel %vm814_vm8, %v2055_v19, %v748_v27  ;;  %v810_v12 = vsel %vm809_vm12, %v2034_v59, %v735_v9  ;;  %v844_v9 = vld [vmem:[#allocation2] sm:$0xff] }
  0x9b   : > { %v719_v35 = vmul.f32 %v717_v30, %v715_v29  ;;  %v721_v36 = vmul.f32 %v717_v30, %v711_v20  ;;  %v775_v37 = vcombine.high %v715_v29, %v715_v29  ;;  %v777_v39 = vrot.slane %v715_v29, 1 }
  0x9c   : > { %v2071_v40 = vmul.f32 %v702_v24, %v2067_v31  ;;  %v706_v41 = vmul.f32 %v702_v24, %v2063_v25  ;;  %v821_v6 = vsel %vm819_vm0, %v748_v27, %v760_v32  ;;  %v820_v5 = vsel %vm819_vm0, %v747_v18, %v759_v33 }
  0x9d   : > { %v723_v42 = vsub.f32 1.0, %v721_v36  ;;  %v778_v43 = vrot.slane %v775_v37, 1  ;;  %v787_v44 = vcombine.high %v719_v35, %v719_v35  ;;  %v789_v45 = vrot.slane %v719_v35, 6 }
  0x9e   : > { %v708_v46 = vsub.f32 1.0, %v706_v41  ;;  %v710_v47 = vmul.f32 2.0, %v2071_v40  ;;  %v826_v48 = vsel %vm824_vm2, %v821_v6, %v711_v20  ;;  %v746_v49 = vcombine.high %v2071_v40, %v2071_v40 }
  0x9f   : > { %v790_v50 = vrot.slane %v787_v44, 6  ;;  %v799_v51 = vcombine.high %v723_v42, %v723_v42  ;;  %v801_v8 = vrot.slane %v723_v42, 3  ;;  %v835_v52 = vsel %vm834_vm3, %v777_v39, %v789_v45  ;;  %v846_v44 = vld [vmem:[#allocation2 + $0x10] sm:$0xff]  ;;  %v1063_v45 = vld [vmem:[%s2209_s3 + $0x8] sm:$0xff] }
  0xa0   : > { %v712_v38 = vmul.f32 %v710_v47, %v708_v46  ;;  %v714_v53 = vmul.f32 %v710_v47, %v2071_v40  ;;  %v831_v54 = vsel %vm829_vm6, %v826_v48, %v778_v43  ;;  %v750_v55 = vrot.slane %v746_v49, 2  ;;  %v1062_v48 = vld [vmem:[%s2209_s3] sm:$0xff]  ;;  %v1064_v49 = vld [vmem:[%s2209_s3 + $0x10] sm:$0xff] }
  0xa1   : > { %v802_v56 = vrot.slane %v799_v51, 3  ;;  %v836_v57 = vsel %vm834_vm3, %v778_v43, %v790_v50  ;;  %v840_v58 = vsel %vm839_vm7, %v835_v52, %v801_v8  ;;  %v758_v61 = vcombine.high %v708_v46, %v708_v46  ;;  %v1294_v50 = vld [vmem:[%s2211_s5] sm:$0xf] }
  0xa2   : > { %v716_v62 = vsub.f32 1.0, %v714_v53  ;;  %v718_v4 = vmul.f32 2.0, %v712_v38  ;;  %v825_v26 = vsel %vm824_vm2, %v820_v5, %v769_v34  ;;  %v749_v0 = vrot.slane %v2071_v40, 2  ;;  %v845_v5 = vld [vmem:[#allocation2 + $0x8] sm:$0xff] }
  0xa3   : > { %v841_v2 = vsel %vm839_vm7, %v836_v57, %v802_v56  ;;  %v762_v3 = vrot.slane %v758_v61, 7  ;;  %v830_v7 = vsel %vm829_vm6, %v825_v26, %v777_v39  ;;  %v761_v10 = vrot.slane %v708_v46, 7  ;;  %v1065_v46 = vld [vmem:[%s2209_s3 + $0x18] sm:$0xff] }
  0xa4   : > { %890 = vmatprep.subr.mxu0 %v841_v2  ;;  %v720_v13 = vmul.f32 %v718_v4, %v716_v62  ;;  %v722_v14 = vmul.f32 %v718_v4, %v712_v38  ;;  %v776_v15 = vcombine.high %v716_v62, %v716_v62  ;;  %v779_v16 = vrot.slane %v716_v62, 1 }
  0xa5   : > { %891 = vmatpush1.msra.mxu0 %v840_v58  ;;  %v823_v17 = vsel %vm819_vm0, %v750_v55, %v762_v3  ;;  %v770_v20 = vcombine.low %v712_v38, %v712_v38  ;;  %v822_v29 = vsel %vm819_vm0, %v749_v0, %v761_v10  ;;  %v728_v30 = vcombine.high %v2063_v25, %v2063_v25 }
  0xa6   : > { %v724_v22 = vsub.f32 1.0, %v722_v14  ;;  %v780_v21 = vrot.slane %v776_v15, 1  ;;  %v788_v23 = vcombine.high %v720_v13, %v720_v13  ;;  %v791_v28 = vrot.slane %v720_v13, 6  ;;  %892 = vmatprep.subr.mxu0 %v831_v54 }
  0xa7   : > { %893 = vmatpush1.msra.mxu0 %v830_v7  ;;  %v734_v24 = vcombine.high %v2067_v31, %v2067_v31  ;;  %v828_v32 = vsel %vm824_vm2, %v823_v17, %v712_v38  ;;  %v815_v34 = vsel %vm814_vm8, %v810_v12, %v747_v18  ;;  %v827_v37 = vsel %vm824_vm2, %v822_v29, %v770_v20  ;;  %v1058_v20 = vld [vmem:[#allocation5] sm:$0xff] }
  0xa8   : > { %v792_v19 = vrot.slane %v788_v23, 6  ;;  %v800_v60 = vcombine.high %v724_v22, %v724_v22  ;;  %v803_v27 = vrot.slane %v724_v22, 3  ;;  %v837_v59 = vsel %vm834_vm3, %v779_v16, %v791_v28  ;;  %894 = vmatprep.subr.mxu0 %v816_v11  ;;  %v1059_v23 = vld [vmem:[#allocation5 + $0x8] sm:$0xff] }
  0xa9   : > { %v738_v33 = vrot.slane %v734_v24, 5  ;;  %895 = vmatpush1.msra.mxu0 %v815_v34  ;;  %v737_v39 = vrot.slane %v2067_v31, 5  ;;  %v833_v63 = vsel %vm829_vm6, %v828_v32, %v780_v21  ;;  %v832_v42 = vsel %vm829_vm6, %v827_v37, %v779_v16 }
  0xaa   : > { %v804_v35 = vrot.slane %v800_v60, 3  ;;  %v838_v36 = vsel %vm834_vm3, %v780_v21, %v792_v19  ;;  %v842_v40 = vsel %vm839_vm7, %v837_v59, %v803_v27  ;;  %1580 = vmatmul.mubr.msk.f32.vlgmr.msra.gmra.mxu0 %vm848_vm9, %v844_v9  ;;  %v1829_v47 = vmov 0   ;;  %v1060_v19 = vld [vmem:[#allocation5 + $0x10] sm:$0xff]  ;;  %v1061_v60 = vld [vmem:[#allocation5 + $0x18] sm:$0xff] }
  0xab   : > { %v813_v41 = vsel %vm809_vm12, %v728_v30, %v738_v33  ;;  %v812_v18 = vsel %vm809_vm12, %v2063_v25, %v737_v39  ;;  %934 = vmatprep.mubr.f32.mxu0 %v1822_v1  ;;  %v847_v25 = vld [vmem:[#allocation2 + $0x18] sm:$0xff]  ;;  %1686 = vset.pattern.permute.xlu1 %v1829_v47  ;;  %vm1086_vm0 = vcmask 261120  }
  0xac   : > { %v843_v6 = vsel %vm839_vm7, %v838_v36, %v804_v35  ;;  %v818_v31 = vsel %vm814_vm8, %v813_v41, %v750_v55  ;;  %v817_v43 = vsel %vm814_vm8, %v812_v18, %v749_v0  ;;  %1685 = vset.pattern.permute.xlu0 %v1829_v47  ;;  %1073 = vperm.xlu1 %1686, %v1063_v45  }
  0xad   : > { %979 = vmatprep.subr.mxu1 %v843_v6  ;;  %1083 = vperm.xlu0 %1685, %v1065_v46  }
  0xae   : > { %980 = vmatpush1.msra.mxu1 %v842_v40  ;;  %1581 = vmatmul.mubr.msk.f32.gmra.mxu0 %vm848_vm9, %v845_v5 }
  0xaf   : > { %981 = vmatprep.subr.mxu1 %v833_v63  ;;  %940 = vmatprep.mubr.f32.mxu0 %v1822_v1 }
  0xb0   : > { %982 = vmatpush1.msra.mxu1 %v832_v42  ;;  %1068 = vperm.xlu1 %1686, %v1062_v48  }
  0xb1   : > { %983 = vmatprep.subr.mxu1 %v818_v31  ;;  %1078 = vperm.xlu0 %1685, %v1064_v49  }
  0xb2   : > { %984 = vmatpush1.msra.mxu1 %v817_v43  ;;  %1582 = vmatmul.mubr.msk.f32.gmra.mxu0 %vm848_vm9, %v846_v44 }
  0xb3   : > { %1586 = vmatmul.mubr.msk.f32.vlgmr.msra.gmra.mxu1 %vm848_vm9, %v844_v9  ;;  %946 = vmatprep.mubr.f32.mxu0 %v1822_v1 }
  0xb4   : > { %1023 = vmatprep.mubr.f32.mxu1 %v1822_v1 }
  0xb5   : > { %1297 = vperm.xlu0 %1685, %v1294_v50  }
  0xb6   : > { %1583 = vmatmul.mubr.msk.f32.gmra.mxu0 %vm848_vm9, %v847_v25 }
  0xb7   : > { %1587 = vmatmul.mubr.msk.f32.gmra.mxu1 %vm848_vm9, %v845_v5  ;;  %1163 = vmatprep.mubr.f32.mxu0 %v1822_v1 }
  0xb8   : > { %1029 = vmatprep.mubr.f32.mxu1 %v1822_v1 }
  0xbb   : > { %1588 = vmatmul.mubr.msk.f32.gmra.mxu1 %vm848_vm9, %v846_v44 }
  0xbc   : > { %1035 = vmatprep.mubr.f32.mxu1 %v1822_v1 }
  0xbf   : > { %1589 = vmatmul.mubr.msk.f32.gmra.mxu1 %vm848_vm9, %v847_v25 }
  0xc0   : > { %1252 = vmatprep.mubr.f32.mxu1 %v1822_v1 }
 0x127   : > { %v1074_v39 = vpop.permute.xlu1 %1073 }
 0x128   : > { %v1084_v33 = vpop.permute.xlu0 %1083 }
 0x12b   : > { %v1069_v44 = vpop.permute.xlu1 %1068 }
 0x12c   : > { %v1079_v6 = vpop.permute.xlu0 %1078 }
 0x16a   : > { %v930_v51 = vpop.f32.mrf.mxu0 }
 0x16b   : > { %v1042_v16 = vmax.f32 %v930_v51, 0.0 }
 0x16c   : > { %v932_v8 = vpop.f32.mrf.mxu0 }
 0x16d   : > { %v1043_v15 = vmax.f32 %v932_v8, 0.0 }
 0x16e   : > { %v936_v52 = vpop.f32.mrf.mxu0 }
 0x16f   : > { %v1046_v13 = vmax.f32 %v936_v52, 0.0 }
 0x170   : > { %v938_v38 = vpop.f32.mrf.mxu0 }
 0x171   : > { %v1047_v10 = vmax.f32 %v938_v38, 0.0 }
 0x172   : > { %v942_v54 = vpop.f32.mrf.mxu0 }
 0x173   : > { %v1019_v53 = vpop.f32.mrf.mxu1  ;;  %v1050_v3 = vmax.f32 %v942_v54, 0.0 }
 0x174   : > { %v944_v56 = vpop.f32.mrf.mxu0  ;;  %v1044_v24 = vmax.f32 %v1019_v53, 0.0 }
 0x175   : > { %v1021_v55 = vpop.f32.mrf.mxu1  ;;  %v1051_v2 = vmax.f32 %v944_v56, 0.0 }
 0x176   : > { %v948_v58 = vpop.f32.mrf.mxu0  ;;  %v1045_v30 = vmax.f32 %v1021_v55, 0.0 }
 0x177   : > { %v1025_v57 = vpop.f32.mrf.mxu1  ;;  %v1054_v0 = vmax.f32 %v948_v58, 0.0 }
 0x178   : > { %v950_v62 = vpop.f32.mrf.mxu0  ;;  %v1048_v29 = vmax.f32 %v1025_v57, 0.0 }
 0x179   : > { %v1027_v61 = vpop.f32.mrf.mxu1  ;;  %v1055_v4 = vmax.f32 %v950_v62, 0.0 }
 0x17a   : > { %v1049_v28 = vmax.f32 %v1027_v61, 0.0 }
 0x17b   : > { %v1031_v26 = vpop.f32.mrf.mxu1  ;;  %1123 = vmatprep.subr.mxu0 %v1055_v4  ;;  %v1293_v4 = vld [vmem:[%s2210_s4] sm:$0xf] }
 0x17c   : > { %1124 = vmatpush1.msra.mxu0 %v1054_v0  ;;  %v1052_v21 = vmax.f32 %v1031_v26, 0.0 }
 0x17d   : > { %v1033_v7 = vpop.f32.mrf.mxu1  ;;  %1125 = vmatprep.subr.mxu0 %v1051_v2 }
 0x17e   : > { %1126 = vmatpush1.msra.mxu0 %v1050_v3  ;;  %v1053_v22 = vmax.f32 %v1033_v7, 0.0 }
 0x17f   : > { %v1037_v14 = vpop.f32.mrf.mxu1  ;;  %1127 = vmatprep.subr.mxu0 %v1047_v10 }
 0x180   : > { %1128 = vmatpush1.msra.mxu0 %v1046_v13  ;;  %v1056_v12 = vmax.f32 %v1037_v14, 0.0 }
 0x181   : > { %v1039_v17 = vpop.f32.mrf.mxu1  ;;  %1129 = vmatprep.subr.mxu0 %v1043_v15 }
 0x182   : > { %v1057_v11 = vmax.f32 %v1039_v17, 0.0  ;;  %1130 = vmatpush1.msra.mxu0 %v1042_v16 }
 0x183   : > { %1590 = vmatmul.mubr.msk.f32.vlgmr.msra.gmra.mxu0 %vm1086_vm0, %v1058_v20 }
 0x184   : > { %1212 = vmatprep.subr.mxu1 %v1057_v11  ;;  %1169 = vmatprep.mubr.f32.mxu0 %v1822_v1 }
 0x185   : > { %1213 = vmatpush1.msra.mxu1 %v1056_v12  ;;  %v1298_v12 = vpop.permute.xlu0 %1297 }
 0x186   : > { %1214 = vmatprep.subr.mxu1 %v1053_v22 }
 0x187   : > { %1215 = vmatpush1.msra.mxu1 %v1052_v21  ;;  %1591 = vmatmul.mubr.msk.f32.gmra.mxu0 %vm1086_vm0, %v1059_v23 }
 0x188   : > { %1216 = vmatprep.subr.mxu1 %v1049_v28  ;;  %1175 = vmatprep.mubr.f32.mxu0 %v1822_v1 }
 0x189   : > { %1217 = vmatpush1.msra.mxu1 %v1048_v29 }
 0x18a   : > { %1218 = vmatprep.subr.mxu1 %v1045_v30 }
 0x18b   : > { %1219 = vmatpush1.msra.mxu1 %v1044_v24  ;;  %1592 = vmatmul.mubr.msk.f32.gmra.mxu0 %vm1086_vm0, %v1060_v19 }
 0x18c   : > { %1594 = vmatmul.mubr.msk.f32.vlgmr.msra.gmra.mxu1 %vm1086_vm0, %v1058_v20  ;;  %1181 = vmatprep.mubr.f32.mxu0 %v1822_v1 }
 0x18d   : > { %1258 = vmatprep.mubr.f32.mxu1 %v1822_v1 }
 0x18f   : > { %1593 = vmatmul.mubr.msk.f32.gmra.mxu0 %vm1086_vm0, %v1061_v60 }
 0x190   : > { %1595 = vmatmul.mubr.msk.f32.gmra.mxu1 %vm1086_vm0, %v1059_v23  ;;  %1367 = vmatprep.mubr.f32.mxu0 %v1822_v1 }
 0x191   : > { %1264 = vmatprep.mubr.f32.mxu1 %v1822_v1 }
 0x194   : > { %1596 = vmatmul.mubr.msk.f32.gmra.mxu1 %vm1086_vm0, %v1060_v19 }
 0x195   : > { %1270 = vmatprep.mubr.f32.mxu1 %v1822_v1 }
 0x198   : > { %1597 = vmatmul.mubr.msk.f32.gmra.mxu1 %vm1086_vm0, %v1061_v60 }
 0x199   : > { %1438 = vmatprep.mubr.f32.mxu1 %v1822_v1 }
 0x243   : > { %v1165_v27 = vpop.f32.mrf.mxu0 }
 0x244   : > { %v1166_v51 = vadd.f32 %v1165_v27, %v1069_v44 }
 0x245   : > { %v1167_v59 = vpop.f32.mrf.mxu0 }
 0x246   : > { %v1168_v49 = vadd.f32 %v1167_v59, %v1069_v44  ;;  %v1277_v61 = vmax.f32 %v1166_v51, 0.0 }
 0x247   : > { %v1171_v9 = vpop.f32.mrf.mxu0 }
 0x248   : > { %v1172_v46 = vadd.f32 %v1171_v9, %v1074_v39  ;;  %v1278_v56 = vmax.f32 %v1168_v49, 0.0 }
 0x249   : > { %v1173_v32 = vpop.f32.mrf.mxu0 }
 0x24a   : > { %v1174_v25 = vadd.f32 %v1173_v32, %v1074_v39  ;;  %v1281_v53 = vmax.f32 %v1172_v46, 0.0 }
 0x24b   : > { %v1177_v35 = vpop.f32.mrf.mxu0 }
 0x24c   : > { %v1254_v34 = vpop.f32.mrf.mxu1  ;;  %v1178_v43 = vadd.f32 %v1177_v35, %v1079_v6  ;;  %v1282_v38 = vmax.f32 %v1174_v25, 0.0 }
 0x24d   : > { %v1179_v37 = vpop.f32.mrf.mxu0  ;;  %v1255_v13 = vadd.f32 %v1254_v34, %v1069_v44 }
 0x24e   : > { %v1256_v36 = vpop.f32.mrf.mxu1  ;;  %v1180_v42 = vadd.f32 %v1179_v37, %v1079_v6  ;;  %v1285_v8 = vmax.f32 %v1178_v43, 0.0 }
 0x24f   : > { %v1183_v41 = vpop.f32.mrf.mxu0  ;;  %v1257_v7 = vadd.f32 %v1256_v36, %v1069_v44  ;;  %v1279_v20 = vmax.f32 %v1255_v13, 0.0 }
 0x250   : > { %v1260_v40 = vpop.f32.mrf.mxu1  ;;  %v1184_v18 = vadd.f32 %v1183_v41, %v1084_v33  ;;  %v1286_v50 = vmax.f32 %v1180_v42, 0.0 }
 0x251   : > { %v1185_v5 = vpop.f32.mrf.mxu0  ;;  %v1261_v2 = vadd.f32 %v1260_v40, %v1074_v39  ;;  %v1280_v17 = vmax.f32 %v1257_v7, 0.0 }
 0x252   : > { %v1262_v63 = vpop.f32.mrf.mxu1  ;;  %v1186_v31 = vadd.f32 %v1185_v5, %v1084_v33  ;;  %v1289_v48 = vmax.f32 %v1184_v18, 0.0 }
 0x253   : > { %v1263_v26 = vadd.f32 %v1262_v63, %v1074_v39  ;;  %v1283_v16 = vmax.f32 %v1261_v2, 0.0 }
 0x254   : > { %v1266_v1 = vpop.f32.mrf.mxu1  ;;  %v1290_v45 = vmax.f32 %v1186_v31, 0.0 }
 0x255   : > { %v1267_v62 = vadd.f32 %v1266_v1, %v1079_v6  ;;  %v1284_v15 = vmax.f32 %v1263_v26, 0.0 }
 0x256   : > { %v1268_v47 = vpop.f32.mrf.mxu1  ;;  %1327 = vmatprep.subr.mxu0 %v1290_v45 }
 0x257   : > { %1328 = vmatpush1.msra.mxu0 %v1289_v48  ;;  %v1269_v57 = vadd.f32 %v1268_v47, %v1079_v6  ;;  %v1287_v14 = vmax.f32 %v1267_v62, 0.0 }
 0x258   : > { %v1272_v52 = vpop.f32.mrf.mxu1  ;;  %1329 = vmatprep.subr.mxu0 %v1286_v50 }
 0x259   : > { %v1273_v54 = vadd.f32 %v1272_v52, %v1084_v33  ;;  %1330 = vmatpush1.msra.mxu0 %v1285_v8  ;;  %v1288_v10 = vmax.f32 %v1269_v57, 0.0 }
 0x25a   : > { %v1274_v55 = vpop.f32.mrf.mxu1  ;;  %1331 = vmatprep.subr.mxu0 %v1282_v38 }
 0x25b   : > { %v1275_v58 = vadd.f32 %v1274_v55, %v1084_v33  ;;  %1332 = vmatpush1.msra.mxu0 %v1281_v53  ;;  %v1291_v3 = vmax.f32 %v1273_v54, 0.0 }
 0x25c   : > { %1333 = vmatprep.subr.mxu0 %v1278_v56 }
 0x25d   : > { %v1292_v0 = vmax.f32 %v1275_v58, 0.0  ;;  %1334 = vmatpush1.msra.mxu0 %v1277_v61 }
 0x25e   : > { %1598 = vmatmul.mubr.msk.f32.vlgmr.msra.gmra.mxu0 %vm1086_vm0, %v1293_v4 }
 0x25f   : > { %1398 = vmatprep.subr.mxu1 %v1292_v0 }
 0x260   : > { %1399 = vmatpush1.msra.mxu1 %v1291_v3 }
 0x261   : > { %1400 = vmatprep.subr.mxu1 %v1288_v10 }
 0x262   : > { %1401 = vmatpush1.msra.mxu1 %v1287_v14 }
 0x263   : > { %1402 = vmatprep.subr.mxu1 %v1284_v15 }
 0x264   : > { %1403 = vmatpush1.msra.mxu1 %v1283_v16 }
 0x265   : > { %1404 = vmatprep.subr.mxu1 %v1280_v17 }
 0x266   : > { %1405 = vmatpush1.msra.mxu1 %v1279_v20 }
 0x267   : > { %1599 = vmatmul.mubr.msk.f32.vlgmr.msra.gmra.mxu1 %vm1086_vm0, %v1293_v4 }
 0x31e   : > { %v1369_v11 = vpop.f32.mrf.mxu0 }
 0x31f   : > { %v1370_v21 = vadd.f32 %v1369_v11, %v1298_v12 }
 0x320   : > { %v1371_v22 = vpop.f32.mrf.mxu0 }
 0x321   : > { %v1372_v23 = vadd.f32 %v1371_v22, %v1298_v12 }
 0x323   : > { %v1449_v28 = vcombine.low %v1370_v21, %v1372_v23 }
 0x325   : > { %1453 = vst [vmem:[%s275_s12] sm:$0xff] %v1449_v28 }
 0x327   : > { %v1440_v29 = vpop.f32.mrf.mxu1 }
 0x328   : > { %v1441_v24 = vadd.f32 %v1440_v29, %v1298_v12 }
 0x329   : > { %v1442_v30 = vpop.f32.mrf.mxu1 }
 0x32a   : > { %v1443_v19 = vadd.f32 %v1442_v30, %v1298_v12 }
 0x32c   : > { %v1450_v60 = vcombine.low %v1441_v24, %v1443_v19 }
 0x32e   : > { %1454 = vst [vmem:[%s275_s12 + $0x8] sm:$0xff] %v1450_v60 }
 0x32f   : > { %1760 = shalt.err (!%p1757_p3)
}
 0x330   : > { %s1761_s28 = scalar_lea.hbm %s1468_s17, 256  ;;  %s1765_s10 = scalar_lea.hbm %s2212_s6, 512 }
 0x331   : > { %p1762_p2 = scmp.ne.s32.totalorder %s1468_s17, %s1761_s28  ;;  %p1766_p7 = scmp.lt.s32.totalorder %s1468_s17, %s2212_s6 }
 0x332   : > { %p1767_p6 = scmp.lt.s32.totalorder %s1765_s10, %s1761_s28 }
 0x333   : > { %p1763_p4 = pnand %p1762_p2, %p1904_p5 }
 0x334   : > { %p1768_p9 = por %p1767_p6, %p1766_p7 }
 0x335   : > { %p1764_p13 = pneg %p1763_p4 }
 0x337   : > { %p1769_p10 = pnand %p1768_p9, %p1764_p13 }
 0x339   : > { %1772 = shalt.err (!%p1769_p10)
}
 0x33a   : > { %1622 = dma.vmem_to_hbm [thread:$0]  (%p1904_p5), %s1471_s14, 256, %s1468_s17, %s1456_s18  }
 0x33b PF: > { %p1639_p12 = scmp.ge.s32.totalorder %s1815_s24, 2  ;;  %s1482_s13 = sand.u32 1, %s1803_s21  }
 0x33c   : > { %p2222_p8 = scmp.ne.s32.totalorder %s2215_s8, 0  ;;  %s1483_s15 = scalar_lea.sflag [#allocation4], %s1482_s13 }
 0x33e   : > { %p1632_p11 = pnand %p1639_p12, %p2222_p8 }
 0x340   : > { %p1633_p0 = pneg %p1632_p11 }
 0x342   : > { %1798 = dma.done.wait (%p1633_p0), %s1483_s15, 256  }
 0x343   : > { %1800 = vsyncadd (%p1633_p0), %s1483_s15, 4294967040  ;;  %p18_p1 = scmp.ge.s32.totalorder %s1891_s27, 4   ;;  %s2223_s21 = smov %s1807_s22 }
 0x344   : > { %s2224_s22 = smov %s1811_s23  ;;  %s2225_s23 = smov %s1902_s30 }
 0x345   : > { %s2226_s24 = smov %s1891_s27  ;;  %20 = sbr.rel (!%p18_p1) target bundleno = 5 (0x5), region = 88 }
 0x34a   :  { %1488 = vsyncpa [#allocation3], 1 }
 0x34b   :  { %1490 = vsyncpa [#allocation3 + $0x1], 1 }
 0x34c   :  { %1491 = vsyncpa [#allocation6], 1 }
 0x34d   :  { %1492 = vsyncpa [#allocation4], 1 }
 0x34e   :  { %1494 = vsyncpa [#allocation4 + $0x1], 1 }

</bundles_post_ra>
